<compile_context>
chip_gen: v7x
topology: tpu7x:2x2x1
jax: 0.10.0
libtpu: 0.0.40
codegen_flags: <defaults>
</compile_context>

<pallas_src>
import functools

import jax
import jax.numpy as jnp
from jax.experimental import pallas as pl
from jax.experimental.pallas import tpu as pltpu


def _cdiv(a, b):
    return (a + b - 1) // b


def _svdd_kernel_general(x_ref, c_ref, o_ref):
    # x_ref: (tb, D) block of encoded rows; c_ref: (1, D) center; o_ref: (tb, 1).
    x = x_ref[...].astype(jnp.float32)
    c = c_ref[...].astype(jnp.float32)
    diff = x - c                                          # VPU, broadcast over rows
    ssq = jnp.sum(diff * diff, axis=1, keepdims=True)     # XLU lane reduction
    o_ref[...] = jnp.sqrt(ssq).astype(o_ref.dtype)        # EUP sqrt


def _svdd_kernel_packed(x_ref, c_ref, o_ref, *, d, r):
    # x_ref: (tb, r*d) block; each vreg row holds r original rows side by side
    # along the 128-lane axis.  c_ref: (1, r*d) center tiled r times.
    # o_ref: (tb, r): distance of original row (row*r + k) goes to lane k.
    x = x_ref[...].astype(jnp.float32)
    c = c_ref[...].astype(jnp.float32)
    diff = x - c
    sq = diff * diff                                      # (tb, r*d), full lanes
    tb = x_ref.shape[0]
    lane = jax.lax.broadcasted_iota(jnp.int32, (tb, r), dimension=1)
    ssq = jnp.zeros((tb, r), dtype=jnp.float32)
    # Static (unrolled) loop over the r lane-segments; each segment is one
    # original row's features.  Only elementwise / broadcast / lane-reduce ops.
    for k in range(r):
        seg = jnp.sum(sq[:, k * d:(k + 1) * d], axis=1, keepdims=True)  # (tb, 1)
        ssq = jnp.where(lane == k, seg, ssq)              # place at lane k
    o_ref[...] = jnp.sqrt(ssq).astype(o_ref.dtype)


def deep_svdd_distances(encoded_data, center, *, block_bytes=4 * 1024 * 1024):
    """||encoded_data - center||_2 along dim=1, like torch.norm(..., dim=1)."""
    n, d = encoded_data.shape
    in_dtype = encoded_data.dtype
    itemsize = jnp.dtype(in_dtype).itemsize
    center_row = center.reshape(1, d).astype(in_dtype)

    # Pack several rows per 128-lane vreg row when D is small, divides 128 and
    # N is a multiple of the packing factor (so the row-major reshape is a
    # free bitcast and no padding copy is needed).
    r_cand = 128 // d if (d < 128 and 128 % d == 0) else 1
    pack = r_cand > 1 and (n % r_cand == 0)
    r = r_cand if pack else 1
    lane_width = d * r
    rows = n // r                      # exact (no remainder) in both paths

    # Largest batch tile (in kernel-view rows) keeping one input block near
    # `block_bytes`; double-buffered this fits every generation's scoped VMEM.
    tb_max = max(8, (block_bytes // max(1, lane_width * itemsize)) // 8 * 8)
    if rows <= tb_max:
        tb = rows                      # block == full array dims: always legal
        grid = 1
    else:
        tb = tb_max                    # multiple of 8; partial last block OK
        grid = _cdiv(rows, tb)

    x = encoded_data.reshape(rows, lane_width) if pack else encoded_data

    if pack:
        kernel = functools.partial(_svdd_kernel_packed, d=d, r=r)
        c_arg = jnp.tile(center_row, (1, r))              # (1, 128)
    else:
        kernel = _svdd_kernel_general
        c_arg = center_row                                # (1, d)

    cost = pl.CostEstimate(
        flops=3 * n * d,                    # sub, square, add per element
        transcendentals=n,                  # one sqrt per row
        bytes_accessed=n * d * itemsize + n * itemsize + d * itemsize,
    )

    out = pl.pallas_call(
        kernel,
        out_shape=jax.ShapeDtypeStruct((rows, r), in_dtype),
        grid_spec=pltpu.PrefetchScalarGridSpec(
            num_scalar_prefetch=0,
            grid=(grid,),
            in_specs=[
                pl.BlockSpec((tb, lane_width), lambda i: (i, 0)),  # batch tile
                pl.BlockSpec((1, lane_width), lambda i: (0, 0)),   # center
            ],
            out_specs=pl.BlockSpec((tb, r), lambda i: (i, 0)),
        ),
        compiler_params=pltpu.CompilerParams(
            dimension_semantics=("parallel",),   # shard batch axis over TCs (v7x)
        ),
        cost_estimate=cost,
    )(x, c_arg)

    # Unpack: row p of the packed output holds original rows p*r .. p*r + r-1.
    return out.reshape(rows * r)[:n]


if __name__ == "__main__":
    key = jax.random.PRNGKey(0)
    k_x, k_c, k_x2, k_c2 = jax.random.split(key, 4)

    # Small latent shapes implied by the DeepSVDD forward pass.
    N, D = 16, 32
    encoded = jax.random.normal(k_x, (N, D), dtype=jnp.float32)
    center = jax.random.normal(k_c, (D,), dtype=jnp.float32)
    radius = jnp.float32(1.0)  # TODO(synk): radius is stored on the module but unused in forward().

    dist = deep_svdd_distances(encoded, center)
    dist = jax.block_until_ready(dist)
    ref = jnp.sqrt(jnp.sum((encoded - center[None, :]) ** 2, axis=1))
    assert dist.shape == (N,)
    assert jnp.allclose(dist, ref, atol=1e-5, rtol=1e-5)

    # Second check: general (non-packed) path with awkward, non-divisible sizes.
    N2, D2 = 37, 200
    encoded2 = jax.random.normal(k_x2, (N2, D2), dtype=jnp.float32)
    center2 = jax.random.normal(k_c2, (D2,), dtype=jnp.float32)
    dist2 = jax.block_until_ready(deep_svdd_distances(encoded2, center2))
    ref2 = jnp.sqrt(jnp.sum((encoded2 - center2[None, :]) ** 2, axis=1))
    assert dist2.shape == (N2,)
    assert jnp.allclose(dist2, ref2, atol=1e-5, rtol=1e-5)

    print("KERNEL_OK")
</pallas_src>

<mosaic_0001>
module attributes {stable_mosaic.version = 11 : i64} {
  func.func @_svdd_kernel_packed(%arg0: i32, %arg1: memref<4x128xf32, #tpu.memory_space<vmem>>, %arg2: memref<1x128xf32, #tpu.memory_space<vmem>>, %arg3: memref<4x4xf32, #tpu.memory_space<vmem>>) attributes {dimension_semantics = [#tpu.dimension_semantics<parallel>], iteration_bounds = array<i64: 1>, scalar_prefetch = 0 : i64, scratch_operands = 0 : i64, tpu.core_type = #tpu.core_type<tc>, window_params = [{transform_indices = @transform_0, window_bounds = array<i64: 4, 128>}, {pipeline_mode = #tpu.pipeline_mode<synchronous>, transform_indices = @transform_1, window_bounds = array<i64: 1, 128>}, {transform_indices = @transform_2, window_bounds = array<i64: 4, 4>}]} {
    %c0 = arith.constant 0 : index
    %c0_0 = arith.constant 0 : index
    %0 = vector.load %arg1[%c0, %c0_0] : memref<4x128xf32, #tpu.memory_space<vmem>>, vector<4x128xf32>
    %c0_1 = arith.constant 0 : index
    %c0_2 = arith.constant 0 : index
    %1 = vector.load %arg2[%c0_1, %c0_2] : memref<1x128xf32, #tpu.memory_space<vmem>>, vector<1x128xf32>
    %2 = vector.broadcast %1 : vector<1x128xf32> to vector<4x128xf32>
    %3 = arith.subf %0, %2 : vector<4x128xf32>
    %4 = arith.mulf %3, %3 : vector<4x128xf32>
    %5 = tpu.iota {dimensions = array<i32: 1>} : vector<4x4xi32>
    %cst = arith.constant 0.000000e+00 : f32
    %6 = vector.broadcast %cst : f32 to vector<4x4xf32>
    %7 = vector.extract_strided_slice %4 {offsets = [0, 0], sizes = [4, 32], strides = [1, 1]} : vector<4x128xf32> to vector<4x32xf32>
    %cst_3 = arith.constant dense<0.000000e+00> : vector<4xf32>
    %8 = vector.multi_reduction <add>, %7, %cst_3 [1] : vector<4x32xf32> to vector<4xf32>
    %9 = vector.shape_cast %8 : vector<4xf32> to vector<4x1xf32>
    %c0_i32 = arith.constant 0 : i32
    %10 = vector.broadcast %c0_i32 : i32 to vector<4x4xi32>
    %11 = arith.cmpi eq, %5, %10 : vector<4x4xi32>
    %12 = vector.shape_cast %9 : vector<4x1xf32> to vector<4x1xf32>
    %13 = vector.broadcast %12 : vector<4x1xf32> to vector<4x4xf32>
    %14 = arith.select %11, %13, %6 : vector<4x4xi1>, vector<4x4xf32>
    %15 = vector.extract_strided_slice %4 {offsets = [0, 32], sizes = [4, 32], strides = [1, 1]} : vector<4x128xf32> to vector<4x32xf32>
    %cst_4 = arith.constant dense<0.000000e+00> : vector<4xf32>
    %16 = vector.multi_reduction <add>, %15, %cst_4 [1] : vector<4x32xf32> to vector<4xf32>
    %17 = vector.shape_cast %16 : vector<4xf32> to vector<4x1xf32>
    %c1_i32 = arith.constant 1 : i32
    %18 = vector.broadcast %c1_i32 : i32 to vector<4x4xi32>
    %19 = arith.cmpi eq, %5, %18 : vector<4x4xi32>
    %20 = vector.shape_cast %17 : vector<4x1xf32> to vector<4x1xf32>
    %21 = vector.broadcast %20 : vector<4x1xf32> to vector<4x4xf32>
    %22 = arith.select %19, %21, %14 : vector<4x4xi1>, vector<4x4xf32>
    %23 = vector.extract_strided_slice %4 {offsets = [0, 64], sizes = [4, 32], strides = [1, 1]} : vector<4x128xf32> to vector<4x32xf32>
    %cst_5 = arith.constant dense<0.000000e+00> : vector<4xf32>
    %24 = vector.multi_reduction <add>, %23, %cst_5 [1] : vector<4x32xf32> to vector<4xf32>
    %25 = vector.shape_cast %24 : vector<4xf32> to vector<4x1xf32>
    %c2_i32 = arith.constant 2 : i32
    %26 = vector.broadcast %c2_i32 : i32 to vector<4x4xi32>
    %27 = arith.cmpi eq, %5, %26 : vector<4x4xi32>
    %28 = vector.shape_cast %25 : vector<4x1xf32> to vector<4x1xf32>
    %29 = vector.broadcast %28 : vector<4x1xf32> to vector<4x4xf32>
    %30 = arith.select %27, %29, %22 : vector<4x4xi1>, vector<4x4xf32>
    %31 = vector.extract_strided_slice %4 {offsets = [0, 96], sizes = [4, 32], strides = [1, 1]} : vector<4x128xf32> to vector<4x32xf32>
    %cst_6 = arith.constant dense<0.000000e+00> : vector<4xf32>
    %32 = vector.multi_reduction <add>, %31, %cst_6 [1] : vector<4x32xf32> to vector<4xf32>
    %33 = vector.shape_cast %32 : vector<4xf32> to vector<4x1xf32>
    %c3_i32 = arith.constant 3 : i32
    %34 = vector.broadcast %c3_i32 : i32 to vector<4x4xi32>
    %35 = arith.cmpi eq, %5, %34 : vector<4x4xi32>
    %36 = vector.shape_cast %33 : vector<4x1xf32> to vector<4x1xf32>
    %37 = vector.broadcast %36 : vector<4x1xf32> to vector<4x4xf32>
    %38 = arith.select %35, %37, %30 : vector<4x4xi1>, vector<4x4xf32>
    %39 = math.sqrt %38 : vector<4x4xf32>
    %c0_7 = arith.constant 0 : index
    %c0_8 = arith.constant 0 : index
    %40 = vector.load %arg3[%c0_7, %c0_8] : memref<4x4xf32, #tpu.memory_space<vmem>>, vector<4x4xf32>
    tpu.vector_store %arg3[%c0_7, %c0_8], %39 {strides = array<i32>} : memref<4x4xf32, #tpu.memory_space<vmem>>, vector<4x4xf32>,
    return
  }
  func.func @transform_0(%arg0: i32) -> (i32, i32) {
    %c0_i32 = arith.constant 0 : i32
    %c0_i32_0 = arith.constant 0 : i32
    return %arg0, %c0_i32 : i32, i32
  }
  func.func @transform_1(%arg0: i32) -> (i32, i32) {
    %c0_i32 = arith.constant 0 : i32
    %c0_i32_0 = arith.constant 0 : i32
    %c0_i32_1 = arith.constant 0 : i32
    return %c0_i32, %c0_i32_0 : i32, i32
  }
  func.func @transform_2(%arg0: i32) -> (i32, i32) {
    %c0_i32 = arith.constant 0 : i32
    %c0_i32_0 = arith.constant 0 : i32
    return %arg0, %c0_i32 : i32, i32
  }
}

</mosaic_0001>

<bundles_post_ra>
// kernel: tpu_custom_call.1
= control target key start
LH: loop header
LB: loop body
LE: loop exit
PB: predicated region body
PF: predicated region fallthrough
CT: control target
= control target key end

     0   :  { %7 = vsyncpa [#allocation3], 0  ;;  %s194_s0 = inlined_call_operand.hbm [shape: f32[4,128], index: 0, kind: input, shape index: {}]   ;;  %s195_s1 = inlined_call_operand.vmem [shape: f32[1,128], index: 1, kind: input, shape index: {}]   ;;  %s196_s2 = inlined_call_operand.hbm [shape: f32[4,4], index: 2, kind: output, shape index: {}]  }
   0x1   :  { %8 = vsyncpa [#allocation4], 0  ;;  %s147_s9 = smov [#allocation2]   ;;  %s99_s13 = scalar_lea.hbm %s194_s0, 64 }
   0x2   :  { %s15_s10 = sshll.u32 %s147_s9, 4  ;;  %p100_p0 = scmp.ne.s32.totalorder %s194_s0, %s99_s13  ;;  %s16_s10 = int_to_ptr.vmem [resolvable:$true] %s15_s10 }
   0x3   :  { %p103_p1 = scmp.lt.u32.totalorder %s99_s13, %s194_s0 }
   0x5   :  { %p105_p2 = pnand %p103_p1, %p100_p0 }
   0x7   :  { %108 = shalt.err (!%p105_p2)
}
   0x8   :  { %s109_s18 = scalar_lea.vmem %s16_s10, 64  ;;  %p114_p4 = scmp.lt.s32.totalorder %s16_s10, %s16_s10 }
   0x9   :  { %p110_p3 = scmp.ne.s32.totalorder %s16_s10, %s109_s18  ;;  %p115_p5 = scmp.lt.s32.totalorder %s109_s18, %s109_s18 }
   0xb   :  { %p116_p6 = por %p115_p5, %p114_p4 }
   0xd   :  { %p117_p7 = pnand %p116_p6, %p110_p3 }
   0xf   :  { %120 = shalt.err (!%p117_p7)
}
  0x10   :  { %18 = dma.hbm_to_vmem [thread:$0]  %s194_s0, 64, %s16_s10, [#allocation3]  }
  0x11   :  { %143 = dma.done.wait [#allocation3], 64  }
  0x12   :  { %144 = vsyncadd [#allocation3], 4294967232  ;;  %v24_v0 = vld [vmem:[#allocation2] sm:$0xf]  ;;  %s148_s23 = smov 96   ;;  %s149_s24 = smov 32   ;;  %v34_v11 = vlaneseq }
  0x13   :  { %v91_v1 = vld [vmem:[%s195_s1] ss:$0 sm:$0xff]  ;;  %s150_s25 = smov 64   ;;  %vm36_vm0 = vcmask 257024   ;;  %s151_s0 = smov [#allocation5]   ;;  %vm74_vm6 = vcmask 27648  }
  0x14   :  { %v32_v2 = vsub.f32 %v24_v0, %v91_v1  ;;  %v35_v12 = vand.u32 127, %v34_v11  ;;  %s82_s1 = sshll.u32 %s151_s0, 4  ;;  %s83_s1 = int_to_ptr.vmem [resolvable:$true] %s82_s1 }
  0x15   :  { %s121_s26 = scalar_lea.vmem %s83_s1, 64  ;;  %p126_p9 = scmp.lt.s32.totalorder %s83_s1, %s83_s1 }
  0x16   :  { %v33_v3 = vmul.f32 %v32_v2, %v32_v2  ;;  %vm40_vm1 = vcmp.eq.s32.totalorder %v35_v12, 0  ;;  %vm49_vm2 = vcmp.eq.s32.totalorder %v35_v12, 1  ;;  %vm57_vm3 = vcmp.eq.s32.totalorder %v35_v12, 2  ;;  %p122_p8 = scmp.ne.s32.totalorder %s83_s1, %s121_s26  ;;  %p127_p10 = scmp.lt.s32.totalorder %s121_s26, %s121_s26 }
  0x17   :  { %vm65_vm4 = vcmp.eq.s32.totalorder %v35_v12, 3 }
  0x18   :  { %43 = vrot.lane.b32.xlu0 %v33_v3, %s148_s23  ;;  %59 = vrot.lane.b32.xlu1 %v33_v3, %s149_s24  ;;  %v37_v4 = vsel %vm36_vm0, %v33_v3, 0.0  ;;  %p128_p11 = por %p127_p10, %p126_p9 }
  0x1a   :  { %p129_p12 = pnand %p128_p11, %p122_p8 }
  0x1c   :  { %51 = vrot.lane.b32.xlu0 %v33_v3, %s150_s25 }
  0x3c   :  { %38 = vadd.xlane.f32.xlu1 %v37_v4 }
  0x8a   :  { %v44_v5 = vpop.permute.xlu0 %43  ;;  %v60_v6 = vpop.permute.xlu1 %59 }
  0x8b   :  { %v46_v7 = vsel %vm36_vm0, %v44_v5, 0.0  ;;  %v62_v8 = vsel %vm36_vm0, %v60_v6, 0.0 }
  0x8c   :  { %47 = vadd.xlane.f32.xlu0 %v46_v7  ;;  %63 = vadd.xlane.f32.xlu1 %v62_v8 }
  0x8e   :  { %v52_v9 = vpop.permute.xlu0 %51 }
  0x8f   :  { %v54_v10 = vsel %vm36_vm0, %v52_v9, 0.0 }
  0x90   :  { %55 = vadd.xlane.f32.xlu0 %v54_v10 }
  0xc9   :  { %v39_v13 = vpop.xlane.xlu1 %38 }
  0xca   :  { %v41_v15 = vsel %vm40_vm1, %v39_v13, 0.0 }
 0x119   :  { %v48_v14 = vpop.xlane.xlu0 %47  ;;  %v64_v16 = vpop.xlane.xlu1 %63 }
 0x11a   :  { %v50_v17 = vsel %vm49_vm2, %v48_v14, %v41_v15 }
 0x11d   :  { %v56_v18 = vpop.xlane.xlu0 %55 }
 0x11e   :  { %v58_v19 = vsel %vm57_vm3, %v56_v18, %v50_v17 }
 0x11f   :  { %v66_v20 = vsel %vm65_vm4, %v64_v16, %v58_v19 }
 0x120   :  { %97 = vrsqrt.f32 %v66_v20  ;;  %vm69_vm5 = vcmp.eq.f32.partialorder %v66_v20, inf  ;;  %v72_v23 = vand.u32 2147483648, %v66_v20  ;;  %vm71_vm7 = vcmp.eq.f32.partialorder %v66_v20, 0.0 }
 0x12a   :  { %v98_v21 = vpop.eup %97 }
 0x12b   :  { %v68_v22 = vmul.f32 %v98_v21, %v66_v20 }
 0x12d   :  { %v70_v24 = vsel %vm69_vm5, %v66_v20, %v68_v22 }
 0x12e   :  { %v73_v25 = vsel %vm71_vm7, %v72_v23, %v70_v24 }
 0x12f   :  { %75 = vst.msk [vmem:[#allocation5] sm:$0xf] %vm74_vm6, %v73_v25 }
 0x130   :  { %132 = shalt.err (!%p129_p12)
}
 0x131   :  { %s133_s29 = scalar_lea.hbm %s196_s2, 64 }
 0x132   :  { %p134_p13 = scmp.ne.s32.totalorder %s196_s2, %s133_s29  ;;  %p137_p0 = scmp.lt.u32.totalorder %s133_s29, %s196_s2 }
 0x134   :  { %p139_p1 = pnand %p137_p0, %p134_p13 }
 0x136   :  { %142 = shalt.err (!%p139_p1)
}
 0x137   :  { %85 = dma.vmem_to_hbm [thread:$0]  %s83_s1, 64, %s196_s2, [#allocation4]  }
 0x138   :  { %145 = dma.done.wait [#allocation4], 64  }
 0x139   :  { %146 = vsyncadd [#allocation4], 4294967232 }
 0x13a   :  { %89 = vsyncpa [#allocation3], 1 }
 0x13b   :  { %90 = vsyncpa [#allocation4], 1 }

</bundles_post_ra>
